<compile_context>
chip_gen: v7x
topology: tpu7x:2x2x1
jax: 0.10.0
libtpu: 0.0.40
codegen_flags: <defaults>
</compile_context>

<pallas_src>
import functools
import math

import jax
import jax.numpy as jnp
from jax.experimental import pallas as pl
from jax.experimental.pallas import tpu as pltpu


def _lstm_kernel(gx_ref, wh_ref, out_ref, hN_ref, cN_ref):
    """One grid step = K consecutive timesteps for one batch block.

    gx_ref : (K, TB, 4H)  precomputed x @ Wi + (bi + bh), f32, time-major
    wh_ref : (H, 4H)      recurrent weight (constant index_map -> VMEM resident)
    out_ref: (K, TB, H)   per-step hidden states for this block
    hN_ref : (TB, H)      final hidden state  -- doubles as the h carry
    cN_ref : (TB, H)      final cell   state  -- doubles as the c carry
    """
    t_blk = pl.program_id(1)

    # Zero-init carries at the first time block of each batch block.
    @pl.when(t_blk == 0)
    def _():
        hN_ref[...] = jnp.zeros_like(hN_ref)
        cN_ref[...] = jnp.zeros_like(cN_ref)

    K = out_ref.shape[0]
    H = hN_ref.shape[-1]

    wh = wh_ref[...]
    h = hN_ref[...]          # (TB, H) f32 carry (VMEM-resident across time)
    c = cN_ref[...]

    for k in range(K):       # static unroll; K is small (<= 32)
        # Static index k -> zero-cost ref view + load.
        gates = gx_ref[k] + jnp.dot(h.astype(wh.dtype), wh,
                                    preferred_element_type=jnp.float32)
        i_g = jax.nn.sigmoid(gates[:, 0 * H:1 * H])
        f_g = jax.nn.sigmoid(gates[:, 1 * H:2 * H])
        g_g = jnp.tanh(gates[:, 2 * H:3 * H])
        o_g = jax.nn.sigmoid(gates[:, 3 * H:4 * H])
        c = f_g * c + i_g * g_g
        h = o_g * jnp.tanh(c)
        # Static-index store into the VMEM output tile; keeps live ranges to
        # just (h, c) instead of accumulating K hidden states for a stack.
        out_ref[k] = h.astype(out_ref.dtype)

    # Persist carries; written back to HBM only once per batch block.
    hN_ref[...] = h
    cN_ref[...] = c


def _pick_batch_block(B):
    # Split the batch in two (one half per v7x TensorCore) only when the
    # halves still satisfy the 8-sublane alignment constraint.
    if B % 16 == 0:
        return B // 2
    return B


def _pick_time_block(T, TB, G):
    # Largest divisor of T that keeps the (double-buffered) gates_x block
    # comfortably inside VMEM and bounded at 32 steps of static unroll.
    bytes_per_step = max(1, TB * G * 4)
    cap = min(32, max(1, (2 * 1024 * 1024) // bytes_per_step))
    for k in range(min(T, cap), 0, -1):
        if T % k == 0:
            return k
    return 1


@functools.partial(jax.jit, static_argnums=(5, 6))
def lstm_forward(x, Wi, Wh, bi, bh, num_layers, matmul_dtype=None):
    """x: (B, T, I) f32. Returns (output (L,T,B,H), (h (L,B,H), c (L,B,H)))."""
    B, T, I = x.shape
    H = Wh.shape[0]
    G = 4 * H

    # ---- Hoisted, time-independent input projection: one big matmul for all
    # timesteps, emitted directly time-major, with both biases folded in. ----
    bias = (bi + bh).astype(jnp.float32).reshape(1, 1, G)
    gates_x = jnp.einsum("bti,ig->tbg", x, Wi,
                         preferred_element_type=jnp.float32) + bias   # (T, B, G)

    wh = Wh if matmul_dtype is None else Wh.astype(matmul_dtype)

    TB = _pick_batch_block(B)              # batch rows per core
    K = _pick_time_block(T, TB, G)         # timesteps per grid step
    n_tb = T // K
    n_bb = B // TB

    out_shapes = (
        jax.ShapeDtypeStruct((T, B, H), jnp.float32),   # per-step hidden (time-major)
        jax.ShapeDtypeStruct((B, H), jnp.float32),      # final h
        jax.ShapeDtypeStruct((B, H), jnp.float32),      # final c
    )

    grid_spec = pltpu.PrefetchScalarGridSpec(
        num_scalar_prefetch=0,
        grid=(n_bb, n_tb),                               # (batch: parallel, time: serial)
        in_specs=[
            pl.BlockSpec((K, TB, G), lambda b, t: (t, b, 0)),   # gates_x block
            pl.BlockSpec((H, G), lambda b, t: (0, 0)),          # Wh (resident)
        ],
        out_specs=[
            pl.BlockSpec((K, TB, H), lambda b, t: (t, b, 0)),   # per-step hidden
            pl.BlockSpec((TB, H), lambda b, t: (b, 0)),         # final h (carry)
            pl.BlockSpec((TB, H), lambda b, t: (b, 0)),         # final c (carry)
        ],
    )

    out_tm, h_last, c_last = pl.pallas_call(
        _lstm_kernel,
        out_shape=out_shapes,
        grid_spec=grid_spec,
        compiler_params=pltpu.CompilerParams(
            dimension_semantics=("parallel", "arbitrary"),
            vmem_limit_bytes=32 * 1024 * 1024,
        ),
    )(gates_x, wh)

    # The PyTorch module returns (L, T, B, H) / (L, B, H) with all layer slices
    # identical (its (B,H) recurrence broadcasts against the zero-initialized
    # (L,B,H) state).  Broadcast only here, at the very end; a real consumer
    # could keep the compact (T, B, H) form and skip this HBM writeback.
    output = jnp.broadcast_to(out_tm[None], (num_layers, T, B, H))
    h = jnp.broadcast_to(h_last[None], (num_layers, B, H))
    c = jnp.broadcast_to(c_last[None], (num_layers, B, H))
    return output, (h, c)


def _reference_lstm(x, Wi, Wh, bi, bh, num_layers):
    """Pure-JAX replica of the PyTorch forward for verification."""
    B, T, _ = x.shape
    H = Wh.shape[0]
    h = jnp.zeros((num_layers, B, H), jnp.float32)
    c = jnp.zeros((num_layers, B, H), jnp.float32)
    outs = []
    for i in range(T):
        gates = x[:, i, :] @ Wi + h[-1] @ Wh + bi + bh
        ig, fg, gg, og = jnp.split(gates, 4, axis=1)
        ig, fg, og = jax.nn.sigmoid(ig), jax.nn.sigmoid(fg), jax.nn.sigmoid(og)
        gg = jnp.tanh(gg)
        c = fg * c + ig * gg
        h = og * jnp.tanh(c)
        outs.append(h[:, None])              # (L, 1, B, H)
    return jnp.concatenate(outs, axis=1), (h, c)


if __name__ == "__main__":
    # Small shapes consistent with the module's forward.
    B, T, INPUT, HIDDEN, LAYERS = 2, 8, 4, 32, 2

    key = jax.random.PRNGKey(0)
    kx, kwi, kwh, kbi, kbh = jax.random.split(key, 5)

    stdv = 1.0 / math.sqrt(HIDDEN)
    x = jax.random.normal(kx, (B, T, INPUT), jnp.float32)
    Wi = jax.random.uniform(kwi, (INPUT, 4 * HIDDEN), jnp.float32, -stdv, stdv)
    Wh = jax.random.uniform(kwh, (HIDDEN, 4 * HIDDEN), jnp.float32, -stdv, stdv)
    bi = jax.random.uniform(kbi, (4 * HIDDEN,), jnp.float32, -stdv, stdv)
    bh = jax.random.uniform(kbh, (4 * HIDDEN,), jnp.float32, -stdv, stdv)

    output, (h, c) = lstm_forward(x, Wi, Wh, bi, bh, LAYERS)
    jax.block_until_ready((output, h, c))

    assert output.shape == (LAYERS, T, B, HIDDEN)
    assert h.shape == (LAYERS, B, HIDDEN) and c.shape == (LAYERS, B, HIDDEN)

    ref_out, (ref_h, ref_c) = _reference_lstm(x, Wi, Wh, bi, bh, LAYERS)
    assert jnp.allclose(output, ref_out, atol=1e-4, rtol=1e-4)
    assert jnp.allclose(h, ref_h, atol=1e-4, rtol=1e-4)
    assert jnp.allclose(c, ref_c, atol=1e-4, rtol=1e-4)

    print("KERNEL_OK")
</pallas_src>

<mosaic_0001>
module attributes {stable_mosaic.version = 11 : i64} {
  func.func @_lstm_kernel(%arg0: i32, %arg1: i32, %arg2: memref<8x2x128xf32, #tpu.memory_space<vmem>>, %arg3: memref<32x128xf32, #tpu.memory_space<vmem>>, %arg4: memref<8x2x32xf32, #tpu.memory_space<vmem>>, %arg5: memref<2x32xf32, #tpu.memory_space<vmem>>, %arg6: memref<2x32xf32, #tpu.memory_space<vmem>>) attributes {dimension_semantics = [#tpu.dimension_semantics<parallel>, #tpu.dimension_semantics<arbitrary>], iteration_bounds = array<i64: 1, 1>, scalar_prefetch = 0 : i64, scratch_operands = 0 : i64, tpu.core_type = #tpu.core_type<tc>, window_params = [{transform_indices = @transform_0, window_bounds = array<i64: 8, 2, 128>}, {pipeline_mode = #tpu.pipeline_mode<synchronous>, transform_indices = @transform_1, window_bounds = array<i64: 32, 128>}, {transform_indices = @transform_2, window_bounds = array<i64: 8, 2, 32>}, {transform_indices = @transform_3, window_bounds = array<i64: 2, 32>}, {transform_indices = @transform_4, window_bounds = array<i64: 2, 32>}]} {
    %c0_i32 = arith.constant 0 : i32
    %0 = arith.cmpi eq, %arg1, %c0_i32 : i32
    %1 = arith.extui %0 : i1 to i32
    %c0_i32_0 = arith.constant 0 : i32
    %2 = arith.cmpi ne, %1, %c0_i32_0 : i32
    scf.if %2 {
      %cst_82 = arith.constant 0.000000e+00 : f32
      %264 = vector.broadcast %cst_82 : f32 to vector<2x32xf32>
      %c0_83 = arith.constant 0 : index
      %c0_84 = arith.constant 0 : index
      %265 = vector.load %arg5[%c0_83, %c0_84] : memref<2x32xf32, #tpu.memory_space<vmem>>, vector<2x32xf32>
      tpu.vector_store %arg5[%c0_83, %c0_84], %264 {strides = array<i32>} : memref<2x32xf32, #tpu.memory_space<vmem>>, vector<2x32xf32>,
      %cst_85 = arith.constant 0.000000e+00 : f32
      %266 = vector.broadcast %cst_85 : f32 to vector<2x32xf32>
      %c0_86 = arith.constant 0 : index
      %c0_87 = arith.constant 0 : index
      %267 = vector.load %arg6[%c0_86, %c0_87] : memref<2x32xf32, #tpu.memory_space<vmem>>, vector<2x32xf32>
      tpu.vector_store %arg6[%c0_86, %c0_87], %266 {strides = array<i32>} : memref<2x32xf32, #tpu.memory_space<vmem>>, vector<2x32xf32>,
    } else {
    }
    %c0 = arith.constant 0 : index
    %c0_1 = arith.constant 0 : index
    %3 = vector.load %arg3[%c0, %c0_1] : memref<32x128xf32, #tpu.memory_space<vmem>>, vector<32x128xf32>
    %c0_2 = arith.constant 0 : index
    %c0_3 = arith.constant 0 : index
    %4 = vector.load %arg5[%c0_2, %c0_3] : memref<2x32xf32, #tpu.memory_space<vmem>>, vector<2x32xf32>
    %c0_4 = arith.constant 0 : index
    %c0_5 = arith.constant 0 : index
    %5 = vector.load %arg6[%c0_4, %c0_5] : memref<2x32xf32, #tpu.memory_space<vmem>>, vector<2x32xf32>
    %c0_6 = arith.constant 0 : index
    %c0_7 = arith.constant 0 : index
    %c0_8 = arith.constant 0 : index
    %6 = vector.load %arg2[%c0_6, %c0_7, %c0_8] : memref<8x2x128xf32, #tpu.memory_space<vmem>>, vector<1x2x128xf32>
    %7 = vector.shape_cast %6 : vector<1x2x128xf32> to vector<2x128xf32>
    %cst = arith.constant dense<0.000000e+00> : vector<2x128xf32>
    %8 = tpu.matmul %4, %3, %cst {dimension_numbers = #tpu.dot_dimension_numbers<[1], [0], [0], [1], [0, 0, 1, 1], [], []>} : vector<2x32xf32>, vector<32x128xf32>, vector<2x128xf32> -> vector<2x128xf32>
    %9 = arith.addf %7, %8 : vector<2x128xf32>
    %10 = vector.extract_strided_slice %9 {offsets = [0, 0], sizes = [2, 32], strides = [1, 1]} : vector<2x128xf32> to vector<2x32xf32>
    %11 = arith.negf %10 : vector<2x32xf32>
    %12 = math.exp %11 : vector<2x32xf32>
    %cst_9 = arith.constant 1.000000e+00 : f32
    %13 = vector.broadcast %cst_9 : f32 to vector<2x32xf32>
    %14 = arith.addf %13, %12 : vector<2x32xf32>
    %15 = arith.divf %13, %14 : vector<2x32xf32>
    %16 = vector.extract_strided_slice %9 {offsets = [0, 32], sizes = [2, 32], strides = [1, 1]} : vector<2x128xf32> to vector<2x32xf32>
    %17 = arith.negf %16 : vector<2x32xf32>
    %18 = math.exp %17 : vector<2x32xf32>
    %cst_10 = arith.constant 1.000000e+00 : f32
    %19 = vector.broadcast %cst_10 : f32 to vector<2x32xf32>
    %20 = arith.addf %19, %18 : vector<2x32xf32>
    %21 = arith.divf %19, %20 : vector<2x32xf32>
    %22 = vector.extract_strided_slice %9 {offsets = [0, 64], sizes = [2, 32], strides = [1, 1]} : vector<2x128xf32> to vector<2x32xf32>
    %23 = math.tanh %22 : vector<2x32xf32>
    %24 = vector.extract_strided_slice %9 {offsets = [0, 96], sizes = [2, 32], strides = [1, 1]} : vector<2x128xf32> to vector<2x32xf32>
    %25 = arith.negf %24 : vector<2x32xf32>
    %26 = math.exp %25 : vector<2x32xf32>
    %cst_11 = arith.constant 1.000000e+00 : f32
    %27 = vector.broadcast %cst_11 : f32 to vector<2x32xf32>
    %28 = arith.addf %27, %26 : vector<2x32xf32>
    %29 = arith.divf %27, %28 : vector<2x32xf32>
    %30 = arith.mulf %21, %5 : vector<2x32xf32>
    %31 = arith.mulf %15, %23 : vector<2x32xf32>
    %32 = arith.addf %30, %31 : vector<2x32xf32>
    %33 = math.tanh %32 : vector<2x32xf32>
    %34 = arith.mulf %29, %33 : vector<2x32xf32>
    %c0_12 = arith.constant 0 : index
    %c0_13 = arith.constant 0 : index
    %c0_14 = arith.constant 0 : index
    %35 = vector.load %arg4[%c0_12, %c0_13, %c0_14] : memref<8x2x32xf32, #tpu.memory_space<vmem>>, vector<1x2x32xf32>
    %36 = vector.shape_cast %35 : vector<1x2x32xf32> to vector<2x32xf32>
    %37 = vector.shape_cast %34 : vector<2x32xf32> to vector<1x2x32xf32>
    tpu.vector_store %arg4[%c0_12, %c0_13, %c0_14], %37 {strides = array<i32>} : memref<8x2x32xf32, #tpu.memory_space<vmem>>, vector<1x2x32xf32>,
    %c1 = arith.constant 1 : index
    %c0_15 = arith.constant 0 : index
    %c0_16 = arith.constant 0 : index
    %38 = vector.load %arg2[%c1, %c0_15, %c0_16] : memref<8x2x128xf32, #tpu.memory_space<vmem>>, vector<1x2x128xf32>
    %39 = vector.shape_cast %38 : vector<1x2x128xf32> to vector<2x128xf32>
    %cst_17 = arith.constant dense<0.000000e+00> : vector<2x128xf32>
    %40 = tpu.matmul %34, %3, %cst_17 {dimension_numbers = #tpu.dot_dimension_numbers<[1], [0], [0], [1], [0, 0, 1, 1], [], []>} : vector<2x32xf32>, vector<32x128xf32>, vector<2x128xf32> -> vector<2x128xf32>
    %41 = arith.addf %39, %40 : vector<2x128xf32>
    %42 = vector.extract_strided_slice %41 {offsets = [0, 0], sizes = [2, 32], strides = [1, 1]} : vector<2x128xf32> to vector<2x32xf32>
    %43 = arith.negf %42 : vector<2x32xf32>
    %44 = math.exp %43 : vector<2x32xf32>
    %cst_18 = arith.constant 1.000000e+00 : f32
    %45 = vector.broadcast %cst_18 : f32 to vector<2x32xf32>
    %46 = arith.addf %45, %44 : vector<2x32xf32>
    %47 = arith.divf %45, %46 : vector<2x32xf32>
    %48 = vector.extract_strided_slice %41 {offsets = [0, 32], sizes = [2, 32], strides = [1, 1]} : vector<2x128xf32> to vector<2x32xf32>
    %49 = arith.negf %48 : vector<2x32xf32>
    %50 = math.exp %49 : vector<2x32xf32>
    %cst_19 = arith.constant 1.000000e+00 : f32
    %51 = vector.broadcast %cst_19 : f32 to vector<2x32xf32>
    %52 = arith.addf %51, %50 : vector<2x32xf32>
    %53 = arith.divf %51, %52 : vector<2x32xf32>
    %54 = vector.extract_strided_slice %41 {offsets = [0, 64], sizes = [2, 32], strides = [1, 1]} : vector<2x128xf32> to vector<2x32xf32>
    %55 = math.tanh %54 : vector<2x32xf32>
    %56 = vector.extract_strided_slice %41 {offsets = [0, 96], sizes = [2, 32], strides = [1, 1]} : vector<2x128xf32> to vector<2x32xf32>
    %57 = arith.negf %56 : vector<2x32xf32>
    %58 = math.exp %57 : vector<2x32xf32>
    %cst_20 = arith.constant 1.000000e+00 : f32
    %59 = vector.broadcast %cst_20 : f32 to vector<2x32xf32>
    %60 = arith.addf %59, %58 : vector<2x32xf32>
    %61 = arith.divf %59, %60 : vector<2x32xf32>
    %62 = arith.mulf %53, %32 : vector<2x32xf32>
    %63 = arith.mulf %47, %55 : vector<2x32xf32>
    %64 = arith.addf %62, %63 : vector<2x32xf32>
    %65 = math.tanh %64 : vector<2x32xf32>
    %66 = arith.mulf %61, %65 : vector<2x32xf32>
    %c1_21 = arith.constant 1 : index
    %c0_22 = arith.constant 0 : index
    %c0_23 = arith.constant 0 : index
    %67 = vector.load %arg4[%c1_21, %c0_22, %c0_23] : memref<8x2x32xf32, #tpu.memory_space<vmem>>, vector<1x2x32xf32>
    %68 = vector.shape_cast %67 : vector<1x2x32xf32> to vector<2x32xf32>
    %69 = vector.shape_cast %66 : vector<2x32xf32> to vector<1x2x32xf32>
    tpu.vector_store %arg4[%c1_21, %c0_22, %c0_23], %69 {strides = array<i32>} : memref<8x2x32xf32, #tpu.memory_space<vmem>>, vector<1x2x32xf32>,
    %c2 = arith.constant 2 : index
    %c0_24 = arith.constant 0 : index
    %c0_25 = arith.constant 0 : index
    %70 = vector.load %arg2[%c2, %c0_24, %c0_25] : memref<8x2x128xf32, #tpu.memory_space<vmem>>, vector<1x2x128xf32>
    %71 = vector.shape_cast %70 : vector<1x2x128xf32> to vector<2x128xf32>
    %cst_26 = arith.constant dense<0.000000e+00> : vector<2x128xf32>
    %72 = tpu.matmul %66, %3, %cst_26 {dimension_numbers = #tpu.dot_dimension_numbers<[1], [0], [0], [1], [0, 0, 1, 1], [], []>} : vector<2x32xf32>, vector<32x128xf32>, vector<2x128xf32> -> vector<2x128xf32>
    %73 = arith.addf %71, %72 : vector<2x128xf32>
    %74 = vector.extract_strided_slice %73 {offsets = [0, 0], sizes = [2, 32], strides = [1, 1]} : vector<2x128xf32> to vector<2x32xf32>
    %75 = arith.negf %74 : vector<2x32xf32>
    %76 = math.exp %75 : vector<2x32xf32>
    %cst_27 = arith.constant 1.000000e+00 : f32
    %77 = vector.broadcast %cst_27 : f32 to vector<2x32xf32>
    %78 = arith.addf %77, %76 : vector<2x32xf32>
    %79 = arith.divf %77, %78 : vector<2x32xf32>
    %80 = vector.extract_strided_slice %73 {offsets = [0, 32], sizes = [2, 32], strides = [1, 1]} : vector<2x128xf32> to vector<2x32xf32>
    %81 = arith.negf %80 : vector<2x32xf32>
    %82 = math.exp %81 : vector<2x32xf32>
    %cst_28 = arith.constant 1.000000e+00 : f32
    %83 = vector.broadcast %cst_28 : f32 to vector<2x32xf32>
    %84 = arith.addf %83, %82 : vector<2x32xf32>
    %85 = arith.divf %83, %84 : vector<2x32xf32>
    %86 = vector.extract_strided_slice %73 {offsets = [0, 64], sizes = [2, 32], strides = [1, 1]} : vector<2x128xf32> to vector<2x32xf32>
    %87 = math.tanh %86 : vector<2x32xf32>
    %88 = vector.extract_strided_slice %73 {offsets = [0, 96], sizes = [2, 32], strides = [1, 1]} : vector<2x128xf32> to vector<2x32xf32>
    %89 = arith.negf %88 : vector<2x32xf32>
    %90 = math.exp %89 : vector<2x32xf32>
    %cst_29 = arith.constant 1.000000e+00 : f32
    %91 = vector.broadcast %cst_29 : f32 to vector<2x32xf32>
    %92 = arith.addf %91, %90 : vector<2x32xf32>
    %93 = arith.divf %91, %92 : vector<2x32xf32>
    %94 = arith.mulf %85, %64 : vector<2x32xf32>
    %95 = arith.mulf %79, %87 : vector<2x32xf32>
    %96 = arith.addf %94, %95 : vector<2x32xf32>
    %97 = math.tanh %96 : vector<2x32xf32>
    %98 = arith.mulf %93, %97 : vector<2x32xf32>
    %c2_30 = arith.constant 2 : index
    %c0_31 = arith.constant 0 : index
    %c0_32 = arith.constant 0 : index
    %99 = vector.load %arg4[%c2_30, %c0_31, %c0_32] : memref<8x2x32xf32, #tpu.memory_space<vmem>>, vector<1x2x32xf32>
    %100 = vector.shape_cast %99 : vector<1x2x32xf32> to vector<2x32xf32>
    %101 = vector.shape_cast %98 : vector<2x32xf32> to vector<1x2x32xf32>
    tpu.vector_store %arg4[%c2_30, %c0_31, %c0_32], %101 {strides = array<i32>} : memref<8x2x32xf32, #tpu.memory_space<vmem>>, vector<1x2x32xf32>,
    %c3 = arith.constant 3 : index
    %c0_33 = arith.constant 0 : index
    %c0_34 = arith.constant 0 : index
    %102 = vector.load %arg2[%c3, %c0_33, %c0_34] : memref<8x2x128xf32, #tpu.memory_space<vmem>>, vector<1x2x128xf32>
    %103 = vector.shape_cast %102 : vector<1x2x128xf32> to vector<2x128xf32>
    %cst_35 = arith.constant dense<0.000000e+00> : vector<2x128xf32>
    %104 = tpu.matmul %98, %3, %cst_35 {dimension_numbers = #tpu.dot_dimension_numbers<[1], [0], [0], [1], [0, 0, 1, 1], [], []>} : vector<2x32xf32>, vector<32x128xf32>, vector<2x128xf32> -> vector<2x128xf32>
    %105 = arith.addf %103, %104 : vector<2x128xf32>
    %106 = vector.extract_strided_slice %105 {offsets = [0, 0], sizes = [2, 32], strides = [1, 1]} : vector<2x128xf32> to vector<2x32xf32>
    %107 = arith.negf %106 : vector<2x32xf32>
    %108 = math.exp %107 : vector<2x32xf32>
    %cst_36 = arith.constant 1.000000e+00 : f32
    %109 = vector.broadcast %cst_36 : f32 to vector<2x32xf32>
    %110 = arith.addf %109, %108 : vector<2x32xf32>
    %111 = arith.divf %109, %110 : vector<2x32xf32>
    %112 = vector.extract_strided_slice %105 {offsets = [0, 32], sizes = [2, 32], strides = [1, 1]} : vector<2x128xf32> to vector<2x32xf32>
    %113 = arith.negf %112 : vector<2x32xf32>
    %114 = math.exp %113 : vector<2x32xf32>
    %cst_37 = arith.constant 1.000000e+00 : f32
    %115 = vector.broadcast %cst_37 : f32 to vector<2x32xf32>
    %116 = arith.addf %115, %114 : vector<2x32xf32>
    %117 = arith.divf %115, %116 : vector<2x32xf32>
    %118 = vector.extract_strided_slice %105 {offsets = [0, 64], sizes = [2, 32], strides = [1, 1]} : vector<2x128xf32> to vector<2x32xf32>
    %119 = math.tanh %118 : vector<2x32xf32>
    %120 = vector.extract_strided_slice %105 {offsets = [0, 96], sizes = [2, 32], strides = [1, 1]} : vector<2x128xf32> to vector<2x32xf32>
    %121 = arith.negf %120 : vector<2x32xf32>
    %122 = math.exp %121 : vector<2x32xf32>
    %cst_38 = arith.constant 1.000000e+00 : f32
    %123 = vector.broadcast %cst_38 : f32 to vector<2x32xf32>
    %124 = arith.addf %123, %122 : vector<2x32xf32>
    %125 = arith.divf %123, %124 : vector<2x32xf32>
    %126 = arith.mulf %117, %96 : vector<2x32xf32>
    %127 = arith.mulf %111, %119 : vector<2x32xf32>
    %128 = arith.addf %126, %127 : vector<2x32xf32>
    %129 = math.tanh %128 : vector<2x32xf32>
    %130 = arith.mulf %125, %129 : vector<2x32xf32>
    %c3_39 = arith.constant 3 : index
    %c0_40 = arith.constant 0 : index
    %c0_41 = arith.constant 0 : index
    %131 = vector.load %arg4[%c3_39, %c0_40, %c0_41] : memref<8x2x32xf32, #tpu.memory_space<vmem>>, vector<1x2x32xf32>
    %132 = vector.shape_cast %131 : vector<1x2x32xf32> to vector<2x32xf32>
    %133 = vector.shape_cast %130 : vector<2x32xf32> to vector<1x2x32xf32>
    tpu.vector_store %arg4[%c3_39, %c0_40, %c0_41], %133 {strides = array<i32>} : memref<8x2x32xf32, #tpu.memory_space<vmem>>, vector<1x2x32xf32>,
    %c4 = arith.constant 4 : index
    %c0_42 = arith.constant 0 : index
    %c0_43 = arith.constant 0 : index
    %134 = vector.load %arg2[%c4, %c0_42, %c0_43] : memref<8x2x128xf32, #tpu.memory_space<vmem>>, vector<1x2x128xf32>
    %135 = vector.shape_cast %134 : vector<1x2x128xf32> to vector<2x128xf32>
    %cst_44 = arith.constant dense<0.000000e+00> : vector<2x128xf32>
    %136 = tpu.matmul %130, %3, %cst_44 {dimension_numbers = #tpu.dot_dimension_numbers<[1], [0], [0], [1], [0, 0, 1, 1], [], []>} : vector<2x32xf32>, vector<32x128xf32>, vector<2x128xf32> -> vector<2x128xf32>
    %137 = arith.addf %135, %136 : vector<2x128xf32>
    %138 = vector.extract_strided_slice %137 {offsets = [0, 0], sizes = [2, 32], strides = [1, 1]} : vector<2x128xf32> to vector<2x32xf32>
    %139 = arith.negf %138 : vector<2x32xf32>
    %140 = math.exp %139 : vector<2x32xf32>
    %cst_45 = arith.constant 1.000000e+00 : f32
    %141 = vector.broadcast %cst_45 : f32 to vector<2x32xf32>
    %142 = arith.addf %141, %140 : vector<2x32xf32>
    %143 = arith.divf %141, %142 : vector<2x32xf32>
    %144 = vector.extract_strided_slice %137 {offsets = [0, 32], sizes = [2, 32], strides = [1, 1]} : vector<2x128xf32> to vector<2x32xf32>
    %145 = arith.negf %144 : vector<2x32xf32>
    %146 = math.exp %145 : vector<2x32xf32>
    %cst_46 = arith.constant 1.000000e+00 : f32
    %147 = vector.broadcast %cst_46 : f32 to vector<2x32xf32>
    %148 = arith.addf %147, %146 : vector<2x32xf32>
    %149 = arith.divf %147, %148 : vector<2x32xf32>
    %150 = vector.extract_strided_slice %137 {offsets = [0, 64], sizes = [2, 32], strides = [1, 1]} : vector<2x128xf32> to vector<2x32xf32>
    %151 = math.tanh %150 : vector<2x32xf32>
    %152 = vector.extract_strided_slice %137 {offsets = [0, 96], sizes = [2, 32], strides = [1, 1]} : vector<2x128xf32> to vector<2x32xf32>
    %153 = arith.negf %152 : vector<2x32xf32>
    %154 = math.exp %153 : vector<2x32xf32>
    %cst_47 = arith.constant 1.000000e+00 : f32
    %155 = vector.broadcast %cst_47 : f32 to vector<2x32xf32>
    %156 = arith.addf %155, %154 : vector<2x32xf32>
    %157 = arith.divf %155, %156 : vector<2x32xf32>
    %158 = arith.mulf %149, %128 : vector<2x32xf32>
    %159 = arith.mulf %143, %151 : vector<2x32xf32>
    %160 = arith.addf %158, %159 : vector<2x32xf32>
    %161 = math.tanh %160 : vector<2x32xf32>
    %162 = arith.mulf %157, %161 : vector<2x32xf32>
    %c4_48 = arith.constant 4 : index
    %c0_49 = arith.constant 0 : index
    %c0_50 = arith.constant 0 : index
    %163 = vector.load %arg4[%c4_48, %c0_49, %c0_50] : memref<8x2x32xf32, #tpu.memory_space<vmem>>, vector<1x2x32xf32>
    %164 = vector.shape_cast %163 : vector<1x2x32xf32> to vector<2x32xf32>
    %165 = vector.shape_cast %162 : vector<2x32xf32> to vector<1x2x32xf32>
    tpu.vector_store %arg4[%c4_48, %c0_49, %c0_50], %165 {strides = array<i32>} : memref<8x2x32xf32, #tpu.memory_space<vmem>>, vector<1x2x32xf32>,
    %c5 = arith.constant 5 : index
    %c0_51 = arith.constant 0 : index
    %c0_52 = arith.constant 0 : index
    %166 = vector.load %arg2[%c5, %c0_51, %c0_52] : memref<8x2x128xf32, #tpu.memory_space<vmem>>, vector<1x2x128xf32>
    %167 = vector.shape_cast %166 : vector<1x2x128xf32> to vector<2x128xf32>
    %cst_53 = arith.constant dense<0.000000e+00> : vector<2x128xf32>
    %168 = tpu.matmul %162, %3, %cst_53 {dimension_numbers = #tpu.dot_dimension_numbers<[1], [0], [0], [1], [0, 0, 1, 1], [], []>} : vector<2x32xf32>, vector<32x128xf32>, vector<2x128xf32> -> vector<2x128xf32>
    %169 = arith.addf %167, %168 : vector<2x128xf32>
    %170 = vector.extract_strided_slice %169 {offsets = [0, 0], sizes = [2, 32], strides = [1, 1]} : vector<2x128xf32> to vector<2x32xf32>
    %171 = arith.negf %170 : vector<2x32xf32>
    %172 = math.exp %171 : vector<2x32xf32>
    %cst_54 = arith.constant 1.000000e+00 : f32
    %173 = vector.broadcast %cst_54 : f32 to vector<2x32xf32>
    %174 = arith.addf %173, %172 : vector<2x32xf32>
    %175 = arith.divf %173, %174 : vector<2x32xf32>
    %176 = vector.extract_strided_slice %169 {offsets = [0, 32], sizes = [2, 32], strides = [1, 1]} : vector<2x128xf32> to vector<2x32xf32>
    %177 = arith.negf %176 : vector<2x32xf32>
    %178 = math.exp %177 : vector<2x32xf32>
    %cst_55 = arith.constant 1.000000e+00 : f32
    %179 = vector.broadcast %cst_55 : f32 to vector<2x32xf32>
    %180 = arith.addf %179, %178 : vector<2x32xf32>
    %181 = arith.divf %179, %180 : vector<2x32xf32>
    %182 = vector.extract_strided_slice %169 {offsets = [0, 64], sizes = [2, 32], strides = [1, 1]} : vector<2x128xf32> to vector<2x32xf32>
    %183 = math.tanh %182 : vector<2x32xf32>
    %184 = vector.extract_strided_slice %169 {offsets = [0, 96], sizes = [2, 32], strides = [1, 1]} : vector<2x128xf32> to vector<2x32xf32>
    %185 = arith.negf %184 : vector<2x32xf32>
    %186 = math.exp %185 : vector<2x32xf32>
    %cst_56 = arith.constant 1.000000e+00 : f32
    %187 = vector.broadcast %cst_56 : f32 to vector<2x32xf32>
    %188 = arith.addf %187, %186 : vector<2x32xf32>
    %189 = arith.divf %187, %188 : vector<2x32xf32>
    %190 = arith.mulf %181, %160 : vector<2x32xf32>
    %191 = arith.mulf %175, %183 : vector<2x32xf32>
    %192 = arith.addf %190, %191 : vector<2x32xf32>
    %193 = math.tanh %192 : vector<2x32xf32>
    %194 = arith.mulf %189, %193 : vector<2x32xf32>
    %c5_57 = arith.constant 5 : index
    %c0_58 = arith.constant 0 : index
    %c0_59 = arith.constant 0 : index
    %195 = vector.load %arg4[%c5_57, %c0_58, %c0_59] : memref<8x2x32xf32, #tpu.memory_space<vmem>>, vector<1x2x32xf32>
    %196 = vector.shape_cast %195 : vector<1x2x32xf32> to vector<2x32xf32>
    %197 = vector.shape_cast %194 : vector<2x32xf32> to vector<1x2x32xf32>
    tpu.vector_store %arg4[%c5_57, %c0_58, %c0_59], %197 {strides = array<i32>} : memref<8x2x32xf32, #tpu.memory_space<vmem>>, vector<1x2x32xf32>,
    %c6 = arith.constant 6 : index
    %c0_60 = arith.constant 0 : index
    %c0_61 = arith.constant 0 : index
    %198 = vector.load %arg2[%c6, %c0_60, %c0_61] : memref<8x2x128xf32, #tpu.memory_space<vmem>>, vector<1x2x128xf32>
    %199 = vector.shape_cast %198 : vector<1x2x128xf32> to vector<2x128xf32>
    %cst_62 = arith.constant dense<0.000000e+00> : vector<2x128xf32>
    %200 = tpu.matmul %194, %3, %cst_62 {dimension_numbers = #tpu.dot_dimension_numbers<[1], [0], [0], [1], [0, 0, 1, 1], [], []>} : vector<2x32xf32>, vector<32x128xf32>, vector<2x128xf32> -> vector<2x128xf32>
    %201 = arith.addf %199, %200 : vector<2x128xf32>
    %202 = vector.extract_strided_slice %201 {offsets = [0, 0], sizes = [2, 32], strides = [1, 1]} : vector<2x128xf32> to vector<2x32xf32>
    %203 = arith.negf %202 : vector<2x32xf32>
    %204 = math.exp %203 : vector<2x32xf32>
    %cst_63 = arith.constant 1.000000e+00 : f32
    %205 = vector.broadcast %cst_63 : f32 to vector<2x32xf32>
    %206 = arith.addf %205, %204 : vector<2x32xf32>
    %207 = arith.divf %205, %206 : vector<2x32xf32>
    %208 = vector.extract_strided_slice %201 {offsets = [0, 32], sizes = [2, 32], strides = [1, 1]} : vector<2x128xf32> to vector<2x32xf32>
    %209 = arith.negf %208 : vector<2x32xf32>
    %210 = math.exp %209 : vector<2x32xf32>
    %cst_64 = arith.constant 1.000000e+00 : f32
    %211 = vector.broadcast %cst_64 : f32 to vector<2x32xf32>
    %212 = arith.addf %211, %210 : vector<2x32xf32>
    %213 = arith.divf %211, %212 : vector<2x32xf32>
    %214 = vector.extract_strided_slice %201 {offsets = [0, 64], sizes = [2, 32], strides = [1, 1]} : vector<2x128xf32> to vector<2x32xf32>
    %215 = math.tanh %214 : vector<2x32xf32>
    %216 = vector.extract_strided_slice %201 {offsets = [0, 96], sizes = [2, 32], strides = [1, 1]} : vector<2x128xf32> to vector<2x32xf32>
    %217 = arith.negf %216 : vector<2x32xf32>
    %218 = math.exp %217 : vector<2x32xf32>
    %cst_65 = arith.constant 1.000000e+00 : f32
    %219 = vector.broadcast %cst_65 : f32 to vector<2x32xf32>
    %220 = arith.addf %219, %218 : vector<2x32xf32>
    %221 = arith.divf %219, %220 : vector<2x32xf32>
    %222 = arith.mulf %213, %192 : vector<2x32xf32>
    %223 = arith.mulf %207, %215 : vector<2x32xf32>
    %224 = arith.addf %222, %223 : vector<2x32xf32>
    %225 = math.tanh %224 : vector<2x32xf32>
    %226 = arith.mulf %221, %225 : vector<2x32xf32>
    %c6_66 = arith.constant 6 : index
    %c0_67 = arith.constant 0 : index
    %c0_68 = arith.constant 0 : index
    %227 = vector.load %arg4[%c6_66, %c0_67, %c0_68] : memref<8x2x32xf32, #tpu.memory_space<vmem>>, vector<1x2x32xf32>
    %228 = vector.shape_cast %227 : vector<1x2x32xf32> to vector<2x32xf32>
    %229 = vector.shape_cast %226 : vector<2x32xf32> to vector<1x2x32xf32>
    tpu.vector_store %arg4[%c6_66, %c0_67, %c0_68], %229 {strides = array<i32>} : memref<8x2x32xf32, #tpu.memory_space<vmem>>, vector<1x2x32xf32>,
    %c7 = arith.constant 7 : index
    %c0_69 = arith.constant 0 : index
    %c0_70 = arith.constant 0 : index
    %230 = vector.load %arg2[%c7, %c0_69, %c0_70] : memref<8x2x128xf32, #tpu.memory_space<vmem>>, vector<1x2x128xf32>
    %231 = vector.shape_cast %230 : vector<1x2x128xf32> to vector<2x128xf32>
    %cst_71 = arith.constant dense<0.000000e+00> : vector<2x128xf32>
    %232 = tpu.matmul %226, %3, %cst_71 {dimension_numbers = #tpu.dot_dimension_numbers<[1], [0], [0], [1], [0, 0, 1, 1], [], []>} : vector<2x32xf32>, vector<32x128xf32>, vector<2x128xf32> -> vector<2x128xf32>
    %233 = arith.addf %231, %232 : vector<2x128xf32>
    %234 = vector.extract_strided_slice %233 {offsets = [0, 0], sizes = [2, 32], strides = [1, 1]} : vector<2x128xf32> to vector<2x32xf32>
    %235 = arith.negf %234 : vector<2x32xf32>
    %236 = math.exp %235 : vector<2x32xf32>
    %cst_72 = arith.constant 1.000000e+00 : f32
    %237 = vector.broadcast %cst_72 : f32 to vector<2x32xf32>
    %238 = arith.addf %237, %236 : vector<2x32xf32>
    %239 = arith.divf %237, %238 : vector<2x32xf32>
    %240 = vector.extract_strided_slice %233 {offsets = [0, 32], sizes = [2, 32], strides = [1, 1]} : vector<2x128xf32> to vector<2x32xf32>
    %241 = arith.negf %240 : vector<2x32xf32>
    %242 = math.exp %241 : vector<2x32xf32>
    %cst_73 = arith.constant 1.000000e+00 : f32
    %243 = vector.broadcast %cst_73 : f32 to vector<2x32xf32>
    %244 = arith.addf %243, %242 : vector<2x32xf32>
    %245 = arith.divf %243, %244 : vector<2x32xf32>
    %246 = vector.extract_strided_slice %233 {offsets = [0, 64], sizes = [2, 32], strides = [1, 1]} : vector<2x128xf32> to vector<2x32xf32>
    %247 = math.tanh %246 : vector<2x32xf32>
    %248 = vector.extract_strided_slice %233 {offsets = [0, 96], sizes = [2, 32], strides = [1, 1]} : vector<2x128xf32> to vector<2x32xf32>
    %249 = arith.negf %248 : vector<2x32xf32>
    %250 = math.exp %249 : vector<2x32xf32>
    %cst_74 = arith.constant 1.000000e+00 : f32
    %251 = vector.broadcast %cst_74 : f32 to vector<2x32xf32>
    %252 = arith.addf %251, %250 : vector<2x32xf32>
    %253 = arith.divf %251, %252 : vector<2x32xf32>
    %254 = arith.mulf %245, %224 : vector<2x32xf32>
    %255 = arith.mulf %239, %247 : vector<2x32xf32>
    %256 = arith.addf %254, %255 : vector<2x32xf32>
    %257 = math.tanh %256 : vector<2x32xf32>
    %258 = arith.mulf %253, %257 : vector<2x32xf32>
    %c7_75 = arith.constant 7 : index
    %c0_76 = arith.constant 0 : index
    %c0_77 = arith.constant 0 : index
    %259 = vector.load %arg4[%c7_75, %c0_76, %c0_77] : memref<8x2x32xf32, #tpu.memory_space<vmem>>, vector<1x2x32xf32>
    %260 = vector.shape_cast %259 : vector<1x2x32xf32> to vector<2x32xf32>
    %261 = vector.shape_cast %258 : vector<2x32xf32> to vector<1x2x32xf32>
    tpu.vector_store %arg4[%c7_75, %c0_76, %c0_77], %261 {strides = array<i32>} : memref<8x2x32xf32, #tpu.memory_space<vmem>>, vector<1x2x32xf32>,
    %c0_78 = arith.constant 0 : index
    %c0_79 = arith.constant 0 : index
    %262 = vector.load %arg5[%c0_78, %c0_79] : memref<2x32xf32, #tpu.memory_space<vmem>>, vector<2x32xf32>
    tpu.vector_store %arg5[%c0_78, %c0_79], %258 {strides = array<i32>} : memref<2x32xf32, #tpu.memory_space<vmem>>, vector<2x32xf32>,
    %c0_80 = arith.constant 0 : index
    %c0_81 = arith.constant 0 : index
    %263 = vector.load %arg6[%c0_80, %c0_81] : memref<2x32xf32, #tpu.memory_space<vmem>>, vector<2x32xf32>
    tpu.vector_store %arg6[%c0_80, %c0_81], %256 {strides = array<i32>} : memref<2x32xf32, #tpu.memory_space<vmem>>, vector<2x32xf32>,
    return
  }
  func.func @transform_0(%arg0: i32, %arg1: i32) -> (i32, i32, i32) {
    %c0_i32 = arith.constant 0 : i32
    %c0_i32_0 = arith.constant 0 : i32
    return %arg1, %arg0, %c0_i32 : i32, i32, i32
  }
  func.func @transform_1(%arg0: i32, %arg1: i32) -> (i32, i32) {
    %c0_i32 = arith.constant 0 : i32
    %c0_i32_0 = arith.constant 0 : i32
    %c0_i32_1 = arith.constant 0 : i32
    return %c0_i32, %c0_i32_0 : i32, i32
  }
  func.func @transform_2(%arg0: i32, %arg1: i32) -> (i32, i32, i32) {
    %c0_i32 = arith.constant 0 : i32
    %c0_i32_0 = arith.constant 0 : i32
    return %arg1, %arg0, %c0_i32 : i32, i32, i32
  }
  func.func @transform_3(%arg0: i32, %arg1: i32) -> (i32, i32) {
    %c0_i32 = arith.constant 0 : i32
    %c0_i32_0 = arith.constant 0 : i32
    return %arg0, %c0_i32 : i32, i32
  }
  func.func @transform_4(%arg0: i32, %arg1: i32) -> (i32, i32) {
    %c0_i32 = arith.constant 0 : i32
    %c0_i32_0 = arith.constant 0 : i32
    return %arg0, %c0_i32 : i32, i32
  }
}

</mosaic_0001>

<bundles_post_ra>
// kernel: lstm_forward.1
= control target key start
LH: loop header
LB: loop body
LE: loop exit
PB: predicated region body
PF: predicated region fallthrough
CT: control target
= control target key end

     0   :  { %vm18_vm0 = vcmask 254976   ;;  %v1166_v0 = vmov 0.0|0.0   ;;  %vm1167_vm1 = vmmov 0   ;;  %v1168_v4 = vmov 0.0   ;;  %s1169_s30 = smov 64   ;;  %s1170_s7 = smov 32   ;;  %s1382_s1 = inlined_call_operand.vmem [shape: f32[32,128], index: 1, kind: input, shape index: {}]   ;;  %s1383_s3 = inlined_call_operand.vmem [shape: f32[2,32], index: 3, kind: output, shape index: {1}]   ;;  %s1384_s4 = inlined_call_operand.vmem [shape: f32[2,32], index: 4, kind: output, shape index: {2}]   ;;  %s1385_s0 = inlined_call_operand.vmem [shape: f32[8,2,128], index: 0, kind: input, shape index: {}]   ;;  %s1386_s2 = inlined_call_operand.vmem [shape: f32[8,2,32], index: 2, kind: output, shape index: {0}]  }
   0x1   :  { %1048 = vmatprep.subr.bf16.mxu0 %v1166_v0  ;;  %v21_v1 = vld [vmem:[%s1382_s1] sm:$0xff]  ;;  %v22_v2 = vld [vmem:[%s1382_s1 + $0x8] sm:$0xff]  ;;  %v23_v3 = vld [vmem:[%s1382_s1 + $0x10] sm:$0xff]  ;;  %968 = vmatprep.mubr.msk.f32.mxu0 %vm1167_vm1, %v1168_v4  ;;  %19 = vst.msk [vmem:[%s1383_s3] sm:$0x3] %vm18_vm0, %v1168_v4  ;;  %vm28_vm2 = vcmask 261120  }
   0x2   :  { %v1214_v5 = vpack.c.bf16 %v22_v2, %v21_v1  ;;  %v24_v6 = vld [vmem:[%s1382_s1 + $0x18] sm:$0xff]  ;;  %1054 = vmatprep.subr.bf16.mxu1 %v1166_v0  ;;  %979 = vmatprep.mubr.msk.f32.mxu1 %vm1167_vm1, %v1168_v4  ;;  %20 = vst.msk [vmem:[%s1384_s4] sm:$0x3] %vm18_vm0, %v1168_v4  ;;  %v27_v9 = vld [vmem:[%s1385_s0] sm:$0x3] }
   0x3   :  { %v1223_v7 = vpack.c.bf16 %v24_v6, %v23_v3  ;;  %v892_v29 = vld [vmem:[%s1385_s0 + $0x2] sm:$0x3]  ;;  %v896_v47 = vld [vmem:[%s1385_s0 + $0x4] sm:$0x3]  ;;  %v900_v2 = vld [vmem:[%s1385_s0 + $0x6] sm:$0x3] }
   0x4   :  { %1050 = vmatpush3.bf16.msra.mxu0 %v1214_v5  ;;  %1056 = vmatpush3.bf16.msra.mxu1 %v1214_v5 }
   0x5   :  { %1051 = vmatprep.subr.bf16.mxu0 %v1166_v0  ;;  %1057 = vmatprep.subr.bf16.mxu1 %v1166_v0 }
   0x8   :  { %1053 = vmatpush3.bf16.msra.mxu0 %v1223_v7  ;;  %v25_v8 = vld [vmem:[%s1383_s3] sm:$0x3]  ;;  %1059 = vmatpush3.bf16.msra.mxu1 %v1223_v7 }
   0x9   :  { %1060 = vmatprep.subr.bf16.mxu0 %v1166_v0  ;;  %1066 = vmatprep.subr.bf16.mxu1 %v1166_v0  ;;  %v26_v14 = vld [vmem:[%s1384_s4] sm:$0x3] }
   0xb   :  { %969 = vmatmul.mubr.msk.f32.vlgmr.msra.gmra.mrb[0].mxu0 %vm28_vm2, %v25_v8 }
   0xc   :  { %1062 = vmatpush3.bf16.msra.mxu0 %v1214_v5  ;;  %990 = vmatprep.mubr.msk.f32.mxu0 %vm1167_vm1, %v1168_v4 }
   0xd   :  { %1063 = vmatprep.subr.bf16.mxu0 %v1166_v0 }
  0x10   :  { %1065 = vmatpush3.bf16.msra.mxu0 %v1223_v7 }
  0x11   :  { %1072 = vmatprep.subr.bf16.mxu0 %v1166_v0 }
  0xde   :  { %v98_v10 = vpop.f32.mrb[0].mxu0 }
  0xdf   :  { %v102_v11 = vadd.f32 %v98_v10, %v27_v9  ;;  %v970_v12 = vpop.f32.mrb[1].mxu0 }
  0xe1   :  { %1102 = vtanh.f32 %v102_v11  ;;  %v891_v15 = vmul.f32 -1.442695, %v102_v11 }
  0xe3   :  { %1104 = vpow2.f32 %v891_v15 }
  0xeb   :  { %v1103_v13 = vpop.eup %1102 }
  0xec   :  { %116 = vrot.lane.b32.xlu0 %v1103_v13, %s1169_s30 }
  0xed   :  { %v1105_v16 = vpop.eup %1104 }
  0xee   :  { %v106_v17 = vadd.f32 1.0, %v1105_v16 }
  0xf0   :  { %111 = vrot.lane.b32.xlu0 %v26_v14, %s1170_s7  ;;  %1106 = vrcp.f32 %v106_v17 }
  0xfa   :  { %v1107_v18 = vpop.eup %1106 }
 0x15e   :  { %v117_v19 = vpop.permute.xlu0 %116 }
 0x15f   :  { %v119_v20 = vmul.f32 %v1107_v18, %v117_v19 }
 0x161   :  { %121 = vrot.lane.b32.xlu1 %v119_v20, %s1170_s7 }
 0x162   :  { %v112_v21 = vpop.permute.xlu0 %111 }
 0x163   :  { %v114_v22 = vmul.f32 %v1107_v18, %v112_v21 }
 0x1d3   :  { %v122_v23 = vpop.permute.xlu1 %121 }
 0x1d4   :  { %v124_v24 = vadd.f32 %v122_v23, %v114_v22  ;;  %v904_v23 = vld [vmem:[%s1385_s0 + $0x8] sm:$0x3] }
 0x1d6   :  { %1108 = vtanh.f32 %v124_v24 }
 0x1e0   :  { %v1109_v25 = vpop.eup %1108 }
 0x1e1   :  { %127 = vrot.lane.b32.xlu1 %v1109_v25, %s1169_s30 }
 0x253   :  { %v128_v26 = vpop.permute.xlu1 %127 }
 0x254   :  { %v130_v27 = vmul.f32 %v1107_v18, %v128_v26 }
 0x256   :  { %132 = vrot.lane.b32.xlu0 %v130_v27, %s1170_s7 }
 0x2c8   :  { %v133_v28 = vpop.permute.xlu0 %132 }
 0x2c9   :  { %136 = vst.msk [vmem:[%s1386_s2] sm:$0x3] %vm18_vm0, %v133_v28  ;;  %980 = vmatmul.mubr.msk.f32.vlgmr.msra.gmra.mrb[0].mxu1 %vm28_vm2, %v133_v28 }
 0x2ca   :  { %1068 = vmatpush3.bf16.msra.mxu1 %v1214_v5  ;;  %1001 = vmatprep.mubr.msk.f32.mxu1 %vm1167_vm1, %v1168_v4 }
 0x2cb   :  { %1069 = vmatprep.subr.bf16.mxu1 %v1166_v0 }
 0x2ce   :  { %1071 = vmatpush3.bf16.msra.mxu1 %v1223_v7 }
 0x2cf   :  { %1078 = vmatprep.subr.bf16.mxu1 %v1166_v0 }
 0x39c   :  { %v207_v30 = vpop.f32.mrb[0].mxu1 }
 0x39d   :  { %v211_v31 = vadd.f32 %v892_v29, %v207_v30  ;;  %v981_v32 = vpop.f32.mrb[1].mxu1 }
 0x39f   :  { %1110 = vtanh.f32 %v211_v31  ;;  %v894_v34 = vmul.f32 -1.442695, %v211_v31 }
 0x3a1   :  { %1112 = vpow2.f32 %v894_v34 }
 0x3a9   :  { %v1111_v33 = vpop.eup %1110 }
 0x3aa   :  { %221 = vrot.lane.b32.xlu1 %v1111_v33, %s1169_s30 }
 0x3ab   :  { %v1113_v35 = vpop.eup %1112 }
 0x3ac   :  { %v215_v36 = vadd.f32 1.0, %v1113_v35 }
 0x3ae   :  { %1114 = vrcp.f32 %v215_v36 }
 0x3b8   :  { %v1115_v37 = vpop.eup %1114 }
 0x3b9   :  { %v219_v40 = vmul.f32 %v1115_v37, %v124_v24 }
 0x41c   :  { %v222_v38 = vpop.permute.xlu1 %221 }
 0x41d   :  { %v224_v39 = vmul.f32 %v1115_v37, %v222_v38 }
 0x41f   :  { %226 = vrot.lane.b32.xlu0 %v224_v39, %s1170_s7 }
 0x491   :  { %v227_v41 = vpop.permute.xlu0 %226 }
 0x492   :  { %v229_v42 = vadd.f32 %v227_v41, %v219_v40  ;;  %v908_v41 = vld [vmem:[%s1385_s0 + $0xa] sm:$0x3] }
 0x494   :  { %1116 = vtanh.f32 %v229_v42 }
 0x49e   :  { %v1117_v43 = vpop.eup %1116 }
 0x49f   :  { %232 = vrot.lane.b32.xlu1 %v1117_v43, %s1169_s30 }
 0x511   :  { %v233_v44 = vpop.permute.xlu1 %232 }
 0x512   :  { %v235_v45 = vmul.f32 %v1115_v37, %v233_v44 }
 0x514   :  { %237 = vrot.lane.b32.xlu0 %v235_v45, %s1170_s7 }
 0x586   :  { %v238_v46 = vpop.permute.xlu0 %237 }
 0x587   :  { %895 = vst.msk [vmem:[%s1386_s2 + $0x2] sm:$0x3] %vm18_vm0, %v238_v46  ;;  %991 = vmatmul.mubr.msk.f32.vlgmr.msra.gmra.mrb[2].mxu0 %vm28_vm2, %v238_v46 }
 0x588   :  { %1074 = vmatpush3.bf16.msra.mxu0 %v1214_v5  ;;  %1012 = vmatprep.mubr.msk.f32.mxu0 %vm1167_vm1, %v1168_v4 }
 0x589   :  { %1075 = vmatprep.subr.bf16.mxu0 %v1166_v0 }
 0x58c   :  { %1077 = vmatpush3.bf16.msra.mxu0 %v1223_v7 }
 0x58d   :  { %1084 = vmatprep.subr.bf16.mxu0 %v1166_v0 }
 0x65a   :  { %v312_v48 = vpop.f32.mrb[2].mxu0 }
 0x65b   :  { %v316_v49 = vadd.f32 %v896_v47, %v312_v48  ;;  %v992_v50 = vpop.f32.mrb[3].mxu0 }
 0x65d   :  { %1118 = vtanh.f32 %v316_v49  ;;  %v898_v52 = vmul.f32 -1.442695, %v316_v49 }
 0x65f   :  { %1120 = vpow2.f32 %v898_v52 }
 0x667   :  { %v1119_v51 = vpop.eup %1118 }
 0x668   :  { %326 = vrot.lane.b32.xlu1 %v1119_v51, %s1169_s30 }
 0x669   :  { %v1121_v53 = vpop.eup %1120 }
 0x66a   :  { %v320_v54 = vadd.f32 1.0, %v1121_v53 }
 0x66c   :  { %1122 = vrcp.f32 %v320_v54 }
 0x676   :  { %v1123_v55 = vpop.eup %1122 }
 0x677   :  { %v324_v58 = vmul.f32 %v1123_v55, %v229_v42 }
 0x6da   :  { %v327_v56 = vpop.permute.xlu1 %326 }
 0x6db   :  { %v329_v57 = vmul.f32 %v1123_v55, %v327_v56 }
 0x6dd   :  { %331 = vrot.lane.b32.xlu0 %v329_v57, %s1170_s7 }
 0x74f   :  { %v332_v59 = vpop.permute.xlu0 %331 }
 0x750   :  { %v334_v60 = vadd.f32 %v332_v59, %v324_v58 }
 0x752   :  { %1124 = vtanh.f32 %v334_v60 }
 0x75c   :  { %v1125_v61 = vpop.eup %1124 }
 0x75d   :  { %337 = vrot.lane.b32.xlu1 %v1125_v61, %s1169_s30 }
 0x7cf   :  { %v338_v62 = vpop.permute.xlu1 %337 }
 0x7d0   :  { %v340_v63 = vmul.f32 %v1123_v55, %v338_v62  ;;  %v912_v55 = vld [vmem:[%s1385_s0 + $0xc] sm:$0x3] }
 0x7d2   :  { %342 = vrot.lane.b32.xlu0 %v340_v63, %s1170_s7 }
 0x844   :  { %v343_v1 = vpop.permute.xlu0 %342 }
 0x845   :  { %899 = vst.msk [vmem:[%s1386_s2 + $0x4] sm:$0x3] %vm18_vm0, %v343_v1  ;;  %1002 = vmatmul.mubr.msk.f32.vlgmr.msra.gmra.mrb[2].mxu1 %vm28_vm2, %v343_v1 }
 0x846   :  { %1080 = vmatpush3.bf16.msra.mxu1 %v1214_v5  ;;  %1023 = vmatprep.mubr.msk.f32.mxu1 %vm1167_vm1, %v1168_v4 }
 0x847   :  { %1081 = vmatprep.subr.bf16.mxu1 %v1166_v0 }
 0x84a   :  { %1083 = vmatpush3.bf16.msra.mxu1 %v1223_v7 }
 0x84b   :  { %1090 = vmatprep.subr.bf16.mxu1 %v1166_v0 }
 0x918   :  { %v417_v3 = vpop.f32.mrb[2].mxu1 }
 0x919   :  { %v421_v6 = vadd.f32 %v900_v2, %v417_v3  ;;  %v1003_v8 = vpop.f32.mrb[3].mxu1 }
 0x91b   :  { %1126 = vtanh.f32 %v421_v6  ;;  %v902_v10 = vmul.f32 -1.442695, %v421_v6 }
 0x91d   :  { %1128 = vpow2.f32 %v902_v10 }
 0x925   :  { %v1127_v9 = vpop.eup %1126 }
 0x926   :  { %431 = vrot.lane.b32.xlu1 %v1127_v9, %s1169_s30 }
 0x927   :  { %v1129_v11 = vpop.eup %1128 }
 0x928   :  { %v425_v12 = vadd.f32 1.0, %v1129_v11 }
 0x92a   :  { %1130 = vrcp.f32 %v425_v12 }
 0x934   :  { %v1131_v13 = vpop.eup %1130 }
 0x935   :  { %v429_v16 = vmul.f32 %v1131_v13, %v334_v60 }
 0x998   :  { %v432_v14 = vpop.permute.xlu1 %431 }
 0x999   :  { %v434_v15 = vmul.f32 %v1131_v13, %v432_v14 }
 0x99b   :  { %436 = vrot.lane.b32.xlu0 %v434_v15, %s1170_s7 }
 0xa0d   :  { %v437_v17 = vpop.permute.xlu0 %436 }
 0xa0e   :  { %v439_v18 = vadd.f32 %v437_v17, %v429_v16 }
 0xa10   :  { %1132 = vtanh.f32 %v439_v18 }
 0xa1a   :  { %v1133_v19 = vpop.eup %1132 }
 0xa1b   :  { %442 = vrot.lane.b32.xlu1 %v1133_v19, %s1169_s30 }
 0xa8d   :  { %v443_v20 = vpop.permute.xlu1 %442 }
 0xa8e   :  { %v445_v21 = vmul.f32 %v1131_v13, %v443_v20  ;;  %v916_v13 = vld [vmem:[%s1385_s0 + $0xe] sm:$0x3]  ;;  %s1171_s0 = smov 96  }
 0xa90   :  { %447 = vrot.lane.b32.xlu0 %v445_v21, %s1170_s7 }
 0xb02   :  { %v448_v22 = vpop.permute.xlu0 %447 }
 0xb03   :  { %903 = vst.msk [vmem:[%s1386_s2 + $0x6] sm:$0x3] %vm18_vm0, %v448_v22  ;;  %1013 = vmatmul.mubr.msk.f32.vlgmr.msra.gmra.mrb[4].mxu0 %vm28_vm2, %v448_v22 }
 0xb04   :  { %1086 = vmatpush3.bf16.msra.mxu0 %v1214_v5  ;;  %1034 = vmatprep.mubr.msk.f32.mxu0 %vm1167_vm1, %v1168_v4 }
 0xb05   :  { %1087 = vmatprep.subr.bf16.mxu0 %v1166_v0 }
 0xb08   :  { %1089 = vmatpush3.bf16.msra.mxu0 %v1223_v7 }
 0xbd6   :  { %v522_v24 = vpop.f32.mrb[4].mxu0 }
 0xbd7   :  { %v526_v25 = vadd.f32 %v904_v23, %v522_v24  ;;  %v1014_v26 = vpop.f32.mrb[5].mxu0 }
 0xbd9   :  { %1134 = vtanh.f32 %v526_v25  ;;  %v906_v28 = vmul.f32 -1.442695, %v526_v25 }
 0xbdb   :  { %1136 = vpow2.f32 %v906_v28 }
 0xbe3   :  { %v1135_v27 = vpop.eup %1134 }
 0xbe4   :  { %536 = vrot.lane.b32.xlu1 %v1135_v27, %s1169_s30 }
 0xbe5   :  { %v1137_v29 = vpop.eup %1136 }
 0xbe6   :  { %v530_v30 = vadd.f32 1.0, %v1137_v29 }
 0xbe8   :  { %1138 = vrcp.f32 %v530_v30 }
 0xbf2   :  { %v1139_v31 = vpop.eup %1138 }
 0xbf3   :  { %v534_v34 = vmul.f32 %v1139_v31, %v439_v18 }
 0xc56   :  { %v537_v32 = vpop.permute.xlu1 %536 }
 0xc57   :  { %v539_v33 = vmul.f32 %v1139_v31, %v537_v32 }
 0xc59   :  { %541 = vrot.lane.b32.xlu0 %v539_v33, %s1170_s7 }
 0xccb   :  { %v542_v35 = vpop.permute.xlu0 %541 }
 0xccc   :  { %v544_v36 = vadd.f32 %v542_v35, %v534_v34 }
 0xcce   :  { %1140 = vtanh.f32 %v544_v36 }
 0xcd8   :  { %v1141_v37 = vpop.eup %1140 }
 0xcd9   :  { %547 = vrot.lane.b32.xlu1 %v1141_v37, %s1169_s30 }
 0xd4b   :  { %v548_v38 = vpop.permute.xlu1 %547 }
 0xd4c   :  { %v550_v39 = vmul.f32 %v1139_v31, %v548_v38 }
 0xd4e   :  { %552 = vrot.lane.b32.xlu0 %v550_v39, %s1170_s7 }
 0xdc0   :  { %v553_v40 = vpop.permute.xlu0 %552 }
 0xdc1   :  { %907 = vst.msk [vmem:[%s1386_s2 + $0x8] sm:$0x3] %vm18_vm0, %v553_v40  ;;  %1024 = vmatmul.mubr.msk.f32.vlgmr.msra.gmra.mrb[4].mxu1 %vm28_vm2, %v553_v40 }
 0xdc2   :  { %1092 = vmatpush3.bf16.msra.mxu1 %v1214_v5  ;;  %1045 = vmatprep.mubr.msk.f32.mxu1 %vm1167_vm1, %v1168_v4 }
 0xdc3   :  { %1093 = vmatprep.subr.bf16.mxu1 %v1166_v0 }
 0xdc6   :  { %1095 = vmatpush3.bf16.msra.mxu1 %v1223_v7 }
 0xe94   :  { %v627_v42 = vpop.f32.mrb[4].mxu1 }
 0xe95   :  { %v631_v43 = vadd.f32 %v908_v41, %v627_v42  ;;  %v1025_v44 = vpop.f32.mrb[5].mxu1 }
 0xe97   :  { %1142 = vtanh.f32 %v631_v43  ;;  %v910_v46 = vmul.f32 -1.442695, %v631_v43 }
 0xe99   :  { %1144 = vpow2.f32 %v910_v46 }
 0xea1   :  { %v1143_v45 = vpop.eup %1142 }
 0xea2   :  { %641 = vrot.lane.b32.xlu1 %v1143_v45, %s1169_s30 }
 0xea3   :  { %v1145_v5 = vpop.eup %1144 }
 0xea4   :  { %v635_v47 = vadd.f32 1.0, %v1145_v5 }
 0xea6   :  { %1146 = vrcp.f32 %v635_v47 }
 0xeb0   :  { %v1147_v4 = vpop.eup %1146 }
 0xeb1   :  { %v639_v7 = vmul.f32 %v1147_v4, %v544_v36 }
 0xf14   :  { %v642_v0 = vpop.permute.xlu1 %641 }
 0xf15   :  { %v644_v48 = vmul.f32 %v1147_v4, %v642_v0 }
 0xf17   :  { %646 = vrot.lane.b32.xlu0 %v644_v48, %s1170_s7 }
 0xf89   :  { %v647_v49 = vpop.permute.xlu0 %646 }
 0xf8a   :  { %v649_v50 = vadd.f32 %v647_v49, %v639_v7 }
 0xf8c   :  { %1148 = vtanh.f32 %v649_v50 }
 0xf96   :  { %v1149_v51 = vpop.eup %1148 }
 0xf97   :  { %652 = vrot.lane.b32.xlu1 %v1149_v51, %s1169_s30 }
0x1009   :  { %v653_v52 = vpop.permute.xlu1 %652 }
0x100a   :  { %v655_v53 = vmul.f32 %v1147_v4, %v653_v52 }
0x100c   :  { %657 = vrot.lane.b32.xlu0 %v655_v53, %s1170_s7 }
0x107e   :  { %v658_v54 = vpop.permute.xlu0 %657 }
0x107f   :  { %911 = vst.msk [vmem:[%s1386_s2 + $0xa] sm:$0x3] %vm18_vm0, %v658_v54  ;;  %1035 = vmatmul.mubr.msk.f32.vlgmr.msra.gmra.mrb[6].mxu0 %vm28_vm2, %v658_v54 }
0x1152   :  { %v732_v56 = vpop.f32.mrb[6].mxu0 }
0x1153   :  { %v736_v57 = vadd.f32 %v912_v55, %v732_v56  ;;  %v1036_v58 = vpop.f32.mrb[7].mxu0 }
0x1155   :  { %1150 = vtanh.f32 %v736_v57  ;;  %v914_v60 = vmul.f32 -1.442695, %v736_v57 }
0x1157   :  { %1152 = vpow2.f32 %v914_v60 }
0x115f   :  { %v1151_v59 = vpop.eup %1150 }
0x1160   :  { %746 = vrot.lane.b32.xlu1 %v1151_v59, %s1169_s30 }
0x1161   :  { %v1153_v61 = vpop.eup %1152 }
0x1162   :  { %v740_v62 = vadd.f32 1.0, %v1153_v61 }
0x1164   :  { %1154 = vrcp.f32 %v740_v62 }
0x116e   :  { %v1155_v63 = vpop.eup %1154 }
0x116f   :  { %v744_v3 = vmul.f32 %v1155_v63, %v649_v50 }
0x11d2   :  { %v747_v1 = vpop.permute.xlu1 %746 }
0x11d3   :  { %v749_v2 = vmul.f32 %v1155_v63, %v747_v1 }
0x11d5   :  { %751 = vrot.lane.b32.xlu0 %v749_v2, %s1170_s7 }
0x1247   :  { %v752_v6 = vpop.permute.xlu0 %751 }
0x1248   :  { %v754_v8 = vadd.f32 %v752_v6, %v744_v3 }
0x124a   :  { %1156 = vtanh.f32 %v754_v8 }
0x1254   :  { %v1157_v9 = vpop.eup %1156 }
0x1255   :  { %757 = vrot.lane.b32.xlu1 %v1157_v9, %s1169_s30 }
0x12c7   :  { %v758_v10 = vpop.permute.xlu1 %757 }
0x12c8   :  { %v760_v11 = vmul.f32 %v1155_v63, %v758_v10 }
0x12ca   :  { %762 = vrot.lane.b32.xlu0 %v760_v11, %s1170_s7 }
0x133c   :  { %v763_v12 = vpop.permute.xlu0 %762 }
0x133d   :  { %915 = vst.msk [vmem:[%s1386_s2 + $0xc] sm:$0x3] %vm18_vm0, %v763_v12  ;;  %1046 = vmatmul.mubr.msk.f32.vlgmr.msra.gmra.mrb[6].mxu1 %vm28_vm2, %v763_v12 }
0x1410   :  { %v837_v14 = vpop.f32.mrb[6].mxu1 }
0x1411   :  { %v841_v15 = vadd.f32 %v916_v13, %v837_v14  ;;  %v1047_v16 = vpop.f32.mrb[7].mxu1 }
0x1413   :  { %1158 = vtanh.f32 %v841_v15  ;;  %v918_v18 = vmul.f32 -1.442695, %v841_v15 }
0x1415   :  { %1160 = vpow2.f32 %v918_v18 }
0x141d   :  { %v1159_v17 = vpop.eup %1158 }
0x141e   :  { %851 = vrot.lane.b32.xlu1 %v1159_v17, %s1169_s30 }
0x141f   :  { %v1161_v19 = vpop.eup %1160 }
0x1420   :  { %v845_v20 = vadd.f32 1.0, %v1161_v19 }
0x1422   :  { %1162 = vrcp.f32 %v845_v20 }
0x142c   :  { %v1163_v21 = vpop.eup %1162 }
0x142d   :  { %v849_v24 = vmul.f32 %v1163_v21, %v754_v8 }
0x1490   :  { %v852_v22 = vpop.permute.xlu1 %851 }
0x1491   :  { %v854_v23 = vmul.f32 %v1163_v21, %v852_v22 }
0x1493   :  { %856 = vrot.lane.b32.xlu0 %v854_v23, %s1170_s7 }
0x1505   :  { %v857_v25 = vpop.permute.xlu0 %856 }
0x1506   :  { %v859_v26 = vadd.f32 %v857_v25, %v849_v24 }
0x1508   :  { %1164 = vtanh.f32 %v859_v26 }
0x1512   :  { %v1165_v27 = vpop.eup %1164 }
0x1513   :  { %862 = vrot.lane.b32.xlu1 %v1165_v27, %s1169_s30 }
0x1517   :  { %874 = vrot.lane.b32.xlu1 %v859_v26, %s1171_s0 }
0x1585   :  { %v863_v28 = vpop.permute.xlu1 %862 }
0x1586   :  { %v865_v29 = vmul.f32 %v1163_v21, %v863_v28 }
0x1588   :  { %867 = vrot.lane.b32.xlu0 %v865_v29, %s1170_s7 }
0x1589   :  { %v875_v30 = vpop.permute.xlu1 %874 }
0x158a   :  { %877 = vst.msk [vmem:[%s1384_s4] sm:$0x3] %vm18_vm0, %v875_v30 }
0x15fa   :  { %v868_v31 = vpop.permute.xlu0 %867 }
0x15fb   :  { %919 = vst.msk [vmem:[%s1386_s2 + $0xe] sm:$0x3] %vm18_vm0, %v868_v31  ;;  %872 = vst.msk [vmem:[%s1383_s3] sm:$0x3] %vm18_vm0, %v868_v31 }

</bundles_post_ra>
